<compile_context>
chip_gen: v6e
topology: v6e:2x2x1
jax: 0.10.0
libtpu: 0.0.40
codegen_flags: <defaults>
</compile_context>

<pallas_src>
import jax
import jax.numpy as jnp
from jax.experimental import pallas as pl
from jax.experimental.pallas import tpu as pltpu

_LANE = 128  # hidden / class dims are zero-padded to a multiple of the lane width


def _round_up(n, m):
    return ((n + m - 1) // m) * m


def _vmem_capacity_bytes():
    try:
        info = pltpu.get_tpu_info()
        for name in ("vmem_capacity_bytes", "vmem_size_bytes", "vmem_bytes"):
            v = getattr(info, name, None)
            if v:
                return int(v)
    except Exception:
        pass
    return 64 * 1024 * 1024  # conservative default (v7x per-TensorCore VMEM)


def _classifier_kernel(x_ref, w1_ref, b1_ref, w2_ref, b2_ref, o_ref):
    # x_ref: [TM, F] (stored dtype)     w1_ref: [F, Hp] (compute dtype, e.g. bf16)
    # b1_ref: [1, Hp] f32   w2_ref: [Hp, Cp] f32   b2_ref: [1, Cp] f32
    # o_ref:  [TM, Cp] f32
    # Cast x to the MXU dtype in-kernel (VPU cast hides under the DMA/MXU slots).
    x = x_ref[...].astype(w1_ref.dtype)

    # fc1 + ReLU (padded hidden cols have zero weight / zero bias -> ReLU(0)=0).
    h = jnp.dot(x, w1_ref[...], preferred_element_type=jnp.float32) + b1_ref[...]
    h = jnp.maximum(h, 0.0)

    # fc2 (padded hidden rows of w2 are zero -> no contribution; padded class cols
    # carry b2 = -inf so their exp() is exactly 0).  Small 128x128 contraction, f32.
    logits = jnp.dot(h, w2_ref[...], preferred_element_type=jnp.float32) + b2_ref[...]

    # Numerically-stable softmax over the lane-dense class axis (all f32).
    m = jnp.max(logits, axis=-1, keepdims=True)
    e = jnp.exp(logits - m)
    denom = jnp.sum(e, axis=-1, keepdims=True)
    r = pl.reciprocal(denom, approx=True)      # EUP slot (free-ish)
    r = r * (2.0 - denom * r)                  # one Newton step -> near-exact rows
    o_ref[...] = (e * r).astype(o_ref.dtype)


def prepare_params(w1, b1, w2, b2, *, compute_dtype=jnp.bfloat16):
    """Pad + cast parameters ONCE (hoisted out of the per-call hot path).
    Weights stored transposed vs PyTorch: w1 [F, 100], b1 [100],
    w2 [100, num_classes], b2 [num_classes]."""
    F_dim, H_real = w1.shape
    C_real = w2.shape[1]
    H_pad = _round_up(max(H_real, _LANE), _LANE)
    C_pad = _round_up(max(C_real, _LANE), _LANE)
    w1_p = jnp.zeros((F_dim, H_pad), jnp.float32).at[:, :H_real].set(w1)
    b1_p = jnp.zeros((1, H_pad), jnp.float32).at[:, :H_real].set(b1.reshape(1, -1))
    w2_p = jnp.zeros((H_pad, C_pad), jnp.float32).at[:H_real, :C_real].set(w2)
    b2_p = jnp.full((1, C_pad), -jnp.inf, jnp.float32).at[:, :C_real].set(
        b2.reshape(1, -1))
    w1_p = w1_p.astype(compute_dtype)  # bf16 MXU fast path for the dominant matmul
    return {"w1": w1_p, "b1": b1_p, "w2": w2_p, "b2": b2_p,
            "num_classes": int(C_real), "in_features": int(F_dim)}


def classifier_forward(x, params, *, block_b=512, x_buffers=3):
    """x: [B, ...] (e.g. NCHW like PyTorch); params from prepare_params.
    Returns softmax probabilities [B, num_classes] in float32."""
    w1_p, b1_p, w2_p, b2_p = params["w1"], params["b1"], params["w2"], params["b2"]
    C_real = params["num_classes"]
    B = x.shape[0]
    x2d = x.reshape(B, -1)  # flatten(x, 1); free for contiguous inputs
    F_dim = x2d.shape[1]
    assert F_dim == params["in_features"], "flattened feature dim mismatch"
    H_pad = w1_p.shape[1]
    C_pad = w2_p.shape[1]

    x_isz = jnp.dtype(x2d.dtype).itemsize
    w1_isz = jnp.dtype(w1_p.dtype).itemsize

    # ---- batch-tile sizing from the chip's VMEM capacity ----
    sub = 16 if x_isz <= 2 else 8          # bf16 packs 16 rows / sublane group
    budget = (3 * _vmem_capacity_bytes()) // 4
    fixed = F_dim * H_pad * w1_isz + H_pad * C_pad * 4 + 2 * (H_pad + C_pad) * 4
    per_row = x_buffers * F_dim * x_isz + 2 * C_pad * 4
    tm = min(block_b, max(sub, (budget - fixed) // per_row))
    # v7x megacore: keep the parallel axis at >=2 (ideally >=8) grid steps for large
    # batches without shrinking tiles below 256 rows.
    tm = min(tm, max(256, _round_up(pl.cdiv(B, 8), sub)))
    tm = min(tm, _round_up(B, sub))
    tm = max(sub, (tm // sub) * sub)
    # Prefer a tile that divides the (sublane-rounded) batch -> no x padding pass.
    B_sub = _round_up(B, sub)
    if B_sub % tm != 0:
        for cand in range(tm - sub, max(sub, tm // 2) - 1, -sub):
            if B_sub % cand == 0:
                tm = cand
                break

    B_pad = _round_up(B, tm)
    if B_pad != B:
        # zero pad rows are harmless: finite logits on real classes, -inf on pads
        x2d = jnp.pad(x2d, ((0, B_pad - B), (0, 0)))
    grid_b = B_pad // tm

    need = fixed + per_row * tm
    vmem_limit = int(min(budget, max(32 << 20, need + (8 << 20))))

    cost = pl.CostEstimate(
        flops=2 * B_pad * F_dim * H_pad + 2 * B_pad * H_pad * C_pad,
        transcendentals=B_pad * (C_pad + 1),
        bytes_accessed=(B_pad * F_dim * x_isz          # x stream
                        + F_dim * H_pad * w1_isz        # w1 (resident)
                        + H_pad * C_pad * 4             # w2
                        + (H_pad + C_pad) * 4           # biases
                        + B_pad * C_pad * 4),           # out
    )

    def _run(use_pipeline_modes):
        if use_pipeline_modes:
            x_kw = dict(pipeline_mode=pl.Buffered(x_buffers))  # deep-buffer x stream
            w_kw = dict(pipeline_mode=pl.Buffered(1))          # constant-index: 1 buf
        else:
            x_kw, w_kw = {}, {}
        return pl.pallas_call(
            _classifier_kernel,
            out_shape=jax.ShapeDtypeStruct((B_pad, C_pad), jnp.float32),
            grid=(grid_b,),
            in_specs=[
                pl.BlockSpec((tm, F_dim), lambda i: (i, 0), **x_kw),     # x tile
                pl.BlockSpec((F_dim, H_pad), lambda i: (0, 0), **w_kw),  # w1 resident
                pl.BlockSpec((1, H_pad), lambda i: (0, 0), **w_kw),      # b1 resident
                pl.BlockSpec((H_pad, C_pad), lambda i: (0, 0), **w_kw),  # w2 resident
                pl.BlockSpec((1, C_pad), lambda i: (0, 0), **w_kw),      # b2 resident
            ],
            out_specs=pl.BlockSpec((tm, C_pad), lambda i: (i, 0)),
            compiler_params=pltpu.CompilerParams(
                dimension_semantics=("parallel",),      # megacore sharding on v7x
                vmem_limit_bytes=vmem_limit),
            cost_estimate=cost,
        )(x2d, w1_p, b1_p, w2_p, b2_p)

    # For very large F (>= ~32k on v7x) a second "arbitrary" grid axis over F with an
    # f32 h-accumulator in VMEM scratch would keep the x tile bounded; not needed at
    # these shapes.
    try:
        out = _run(True)
    except Exception:
        out = _run(False)  # fallback for jax versions without BlockSpec pipeline_mode

    # strip batch padding and class-lane padding
    return out[:B, :C_real]


if __name__ == "__main__":
    # Small, module-consistent shapes: x [2, 4, 16, 16] -> flatten -> 1024 features.
    B, C_in, HH, WW = 2, 4, 16, 16
    in_features = C_in * HH * WW
    hidden = 100
    num_classes = 10

    key = jax.random.PRNGKey(0)
    kx, k1, k2, k3, k4 = jax.random.split(key, 5)
    x = jax.random.normal(kx, (B, C_in, HH, WW), jnp.float32)
    bound1 = 1.0 / jnp.sqrt(in_features)
    bound2 = 1.0 / jnp.sqrt(hidden)
    w1 = jax.random.uniform(k1, (in_features, hidden), jnp.float32, -bound1, bound1)
    b1 = jax.random.uniform(k2, (hidden,), jnp.float32, -bound1, bound1)
    w2 = jax.random.uniform(k3, (hidden, num_classes), jnp.float32, -bound2, bound2)
    b2 = jax.random.uniform(k4, (num_classes,), jnp.float32, -bound2, bound2)

    # pure-JAX reference (flatten -> fc1 -> relu -> fc2 -> softmax)
    ref_h = jnp.maximum(x.reshape(B, -1) @ w1 + b1, 0.0)
    ref = jax.nn.softmax(ref_h @ w2 + b2, axis=-1)

    # default throughput path: bf16 w1 / in-kernel x cast, f32 accum + f32 softmax
    params_bf16 = prepare_params(w1, b1, w2, b2, compute_dtype=jnp.bfloat16)
    probs = jax.block_until_ready(classifier_forward(x, params_bf16))
    assert probs.shape == (B, num_classes)
    row_sums = jnp.sum(probs, axis=-1)
    assert bool(jnp.all(jnp.abs(row_sums - 1.0) < 1e-3))
    assert bool(jnp.all(jnp.abs(probs - ref) < 2e-2))

    # f32 compute path cross-check (tighter tolerance)
    params_f32 = prepare_params(w1, b1, w2, b2, compute_dtype=jnp.float32)
    probs32 = jax.block_until_ready(classifier_forward(x, params_f32))
    assert bool(jnp.all(jnp.abs(probs32 - ref) < 5e-3))

    print("KERNEL_OK")
</pallas_src>

<mosaic_0001>
module attributes {stable_mosaic.version = 11 : i64} {
  func.func @_classifier_kernel(%arg0: i32, %arg1: memref<8x1024xf32, #tpu.memory_space<vmem>>, %arg2: memref<1024x128xbf16, #tpu.memory_space<vmem>>, %arg3: memref<1x128xf32, #tpu.memory_space<vmem>>, %arg4: memref<128x128xf32, #tpu.memory_space<vmem>>, %arg5: memref<1x128xf32, #tpu.memory_space<vmem>>, %arg6: memref<8x128xf32, #tpu.memory_space<vmem>>) attributes {dimension_semantics = [#tpu.dimension_semantics<parallel>], iteration_bounds = array<i64: 1>, scalar_prefetch = 0 : i64, scratch_operands = 0 : i64, tpu.core_type = #tpu.core_type<tc>, window_params = [{transform_indices = @transform_0, window_bounds = array<i64: 8, 1024>}, {pipeline_mode = #tpu.pipeline_mode<synchronous>, transform_indices = @transform_1, window_bounds = array<i64: 1024, 128>}, {pipeline_mode = #tpu.pipeline_mode<synchronous>, transform_indices = @transform_2, window_bounds = array<i64: 1, 128>}, {pipeline_mode = #tpu.pipeline_mode<synchronous>, transform_indices = @transform_3, window_bounds = array<i64: 128, 128>}, {pipeline_mode = #tpu.pipeline_mode<synchronous>, transform_indices = @transform_4, window_bounds = array<i64: 1, 128>}, {transform_indices = @transform_5, window_bounds = array<i64: 8, 128>}]} {
    %c0 = arith.constant 0 : index
    %c0_0 = arith.constant 0 : index
    %0 = vector.load %arg1[%c0, %c0_0] : memref<8x1024xf32, #tpu.memory_space<vmem>>, vector<8x1024xf32>
    %1 = arith.truncf %0 : vector<8x1024xf32> to vector<8x1024xbf16>
    %c0_1 = arith.constant 0 : index
    %c0_2 = arith.constant 0 : index
    %2 = vector.load %arg2[%c0_1, %c0_2] : memref<1024x128xbf16, #tpu.memory_space<vmem>>, vector<1024x128xbf16>
    %cst = arith.constant dense<0.000000e+00> : vector<8x128xf32>
    %3 = tpu.matmul %1, %2, %cst {dimension_numbers = #tpu.dot_dimension_numbers<[1], [0], [0], [1], [0, 0, 1, 1], [], []>} : vector<8x1024xbf16>, vector<1024x128xbf16>, vector<8x128xf32> -> vector<8x128xf32>
    %c0_3 = arith.constant 0 : index
    %c0_4 = arith.constant 0 : index
    %4 = vector.load %arg3[%c0_3, %c0_4] : memref<1x128xf32, #tpu.memory_space<vmem>>, vector<1x128xf32>
    %5 = vector.broadcast %4 : vector<1x128xf32> to vector<8x128xf32>
    %6 = arith.addf %3, %5 : vector<8x128xf32>
    %cst_5 = arith.constant 0.000000e+00 : f32
    %7 = vector.broadcast %cst_5 : f32 to vector<8x128xf32>
    %8 = arith.maximumf %6, %7 : vector<8x128xf32>
    %c0_6 = arith.constant 0 : index
    %c0_7 = arith.constant 0 : index
    %9 = vector.load %arg4[%c0_6, %c0_7] : memref<128x128xf32, #tpu.memory_space<vmem>>, vector<128x128xf32>
    %cst_8 = arith.constant dense<0.000000e+00> : vector<8x128xf32>
    %10 = tpu.matmul %8, %9, %cst_8 {dimension_numbers = #tpu.dot_dimension_numbers<[1], [0], [0], [1], [0, 0, 1, 1], [], []>} : vector<8x128xf32>, vector<128x128xf32>, vector<8x128xf32> -> vector<8x128xf32>
    %c0_9 = arith.constant 0 : index
    %c0_10 = arith.constant 0 : index
    %11 = vector.load %arg5[%c0_9, %c0_10] : memref<1x128xf32, #tpu.memory_space<vmem>>, vector<1x128xf32>
    %12 = vector.broadcast %11 : vector<1x128xf32> to vector<8x128xf32>
    %13 = arith.addf %10, %12 : vector<8x128xf32>
    %cst_11 = arith.constant dense<0xFF800000> : vector<8xf32>
    %14 = vector.multi_reduction <maximumf>, %13, %cst_11 [1] : vector<8x128xf32> to vector<8xf32>
    %15 = vector.shape_cast %14 : vector<8xf32> to vector<8x1xf32>
    %16 = vector.broadcast %15 : vector<8x1xf32> to vector<8x128xf32>
    %17 = arith.subf %13, %16 : vector<8x128xf32>
    %18 = math.exp %17 : vector<8x128xf32>
    %cst_12 = arith.constant dense<0.000000e+00> : vector<8xf32>
    %19 = vector.multi_reduction <add>, %18, %cst_12 [1] : vector<8x128xf32> to vector<8xf32>
    %20 = vector.shape_cast %19 : vector<8xf32> to vector<8x1xf32>
    %21 = tpu.reciprocal %20 {approx = true} : vector<8x1xf32> -> vector<8x1xf32>
    %22 = arith.mulf %20, %21 : vector<8x1xf32>
    %cst_13 = arith.constant 2.000000e+00 : f32
    %23 = vector.broadcast %cst_13 : f32 to vector<8x1xf32>
    %24 = arith.subf %23, %22 : vector<8x1xf32>
    %25 = arith.mulf %21, %24 : vector<8x1xf32>
    %26 = vector.broadcast %25 : vector<8x1xf32> to vector<8x128xf32>
    %27 = arith.mulf %18, %26 : vector<8x128xf32>
    %c0_14 = arith.constant 0 : index
    %c0_15 = arith.constant 0 : index
    %28 = vector.load %arg6[%c0_14, %c0_15] : memref<8x128xf32, #tpu.memory_space<vmem>>, vector<8x128xf32>
    tpu.vector_store %arg6[%c0_14, %c0_15], %27 {strides = array<i32>} : memref<8x128xf32, #tpu.memory_space<vmem>>, vector<8x128xf32>,
    return
  }
  func.func @transform_0(%arg0: i32) -> (i32, i32) {
    %c0_i32 = arith.constant 0 : i32
    %c0_i32_0 = arith.constant 0 : i32
    return %arg0, %c0_i32 : i32, i32
  }
  func.func @transform_1(%arg0: i32) -> (i32, i32) {
    %c0_i32 = arith.constant 0 : i32
    %c0_i32_0 = arith.constant 0 : i32
    %c0_i32_1 = arith.constant 0 : i32
    return %c0_i32, %c0_i32_0 : i32, i32
  }
  func.func @transform_2(%arg0: i32) -> (i32, i32) {
    %c0_i32 = arith.constant 0 : i32
    %c0_i32_0 = arith.constant 0 : i32
    %c0_i32_1 = arith.constant 0 : i32
    return %c0_i32, %c0_i32_0 : i32, i32
  }
  func.func @transform_3(%arg0: i32) -> (i32, i32) {
    %c0_i32 = arith.constant 0 : i32
    %c0_i32_0 = arith.constant 0 : i32
    %c0_i32_1 = arith.constant 0 : i32
    return %c0_i32, %c0_i32_0 : i32, i32
  }
  func.func @transform_4(%arg0: i32) -> (i32, i32) {
    %c0_i32 = arith.constant 0 : i32
    %c0_i32_0 = arith.constant 0 : i32
    %c0_i32_1 = arith.constant 0 : i32
    return %c0_i32, %c0_i32_0 : i32, i32
  }
  func.func @transform_5(%arg0: i32) -> (i32, i32) {
    %c0_i32 = arith.constant 0 : i32
    %c0_i32_0 = arith.constant 0 : i32
    return %arg0, %c0_i32 : i32, i32
  }
}

</mosaic_0001>

<bundles_post_ra>
// kernel: tpu_custom_call.1
= control target key start
LH: loop header
LB: loop body
LE: loop exit
PB: predicated region body
PF: predicated region fallthrough
CT: control target
= control target key end

     0   :  { %10 = vsyncpa [#allocation3], 0  ;;  %s1307_s0 = inlined_call_operand.hbm [shape: f32[8,1024], index: 0, kind: input, shape index: {}]   ;;  %s1308_s1 = inlined_call_operand.hbm [shape: bf16[1024,128], index: 1, kind: input, shape index: {}]   ;;  %s1309_s2 = inlined_call_operand.vmem [shape: f32[1,128], index: 2, kind: input, shape index: {}]   ;;  %s1310_s3 = inlined_call_operand.hbm [shape: f32[128,128], index: 3, kind: input, shape index: {}]   ;;  %s1311_s4 = inlined_call_operand.vmem [shape: f32[1,128], index: 4, kind: input, shape index: {}]   ;;  %s1312_s5 = inlined_call_operand.hbm [shape: f32[8,128], index: 5, kind: output, shape index: {}]  }
   0x1   :  { %11 = vsyncpa [#allocation6], 0 }
   0x2   :  { %12 = vsyncpa [#allocation4], 0  ;;  %s1249_s18 = smov [#allocation5]  }
   0x3   :  { %s28_s19 = sshll.u32 %s1249_s18, 4  ;;  %s29_s19 = int_to_ptr.vmem [resolvable:$true] %s28_s19 }
   0x4   :  { %s1171_s20 = scalar_lea.vmem %s29_s19, 8192  ;;  %p1176_p1 = scmp.lt.s32.totalorder %s29_s19, %s29_s19 }
   0x5   :  { %p1172_p0 = scmp.ne.s32.totalorder %s29_s19, %s1171_s20  ;;  %p1177_p2 = scmp.lt.s32.totalorder %s1171_s20, %s1171_s20 }
   0x7   :  { %p1178_p3 = por %p1177_p2, %p1176_p1 }
   0x9   :  { %p1179_p4 = pnand %p1178_p3, %p1172_p0 }
   0xb   :  { %1182 = shalt.err (!%p1179_p4)
}
   0xc   :  { %s1250_s21 = smov 64   ;;  %s1251_s22 = smov 4  }
   0xd   :  { %34 = dma.hbm_to_vmem [thread:$0]  %s1308_s1, 8192, %s29_s19, [#allocation6], %s1250_s21, %s1250_s21, %s1251_s22  }
   0xe   :  { %s1252_s25 = smov [#allocation2]   ;;  %s1253_s27 = smov [#allocation7]  }
   0xf   :  { %s19_s26 = sshll.u32 %s1252_s25, 4  ;;  %s42_s28 = sshll.u32 %s1253_s27, 4  ;;  %s20_s26 = int_to_ptr.vmem [resolvable:$true] %s19_s26  ;;  %s43_s28 = int_to_ptr.vmem [resolvable:$true] %s42_s28 }
  0x10   :  { %s1191_s29 = scalar_lea.vmem %s20_s26, 1024  ;;  %p1196_p6 = scmp.lt.s32.totalorder %s20_s26, %s20_s26 }
  0x11   :  { %p1192_p5 = scmp.ne.s32.totalorder %s20_s26, %s1191_s29  ;;  %p1197_p7 = scmp.lt.s32.totalorder %s1191_s29, %s1191_s29 }
  0x13   :  { %p1198_p8 = por %p1197_p7, %p1196_p6 }
  0x15   :  { %p1199_p9 = pnand %p1198_p8, %p1192_p5 }
  0x17   :  { %1202 = shalt.err (!%p1199_p9)
}
  0x18   :  { %22 = dma.hbm_to_vmem [thread:$0]  %s1307_s0, 1024, %s20_s26, [#allocation3]  }
  0x19   :  { %s1211_s7 = scalar_lea.vmem %s43_s28, 2048  ;;  %p1216_p11 = scmp.lt.s32.totalorder %s43_s28, %s43_s28 }
  0x1a   :  { %p1212_p10 = scmp.ne.s32.totalorder %s43_s28, %s1211_s7  ;;  %p1217_p12 = scmp.lt.s32.totalorder %s1211_s7, %s1211_s7 }
  0x1c   :  { %p1218_p13 = por %p1217_p12, %p1216_p11 }
  0x1e   :  { %p1219_p0 = pnand %p1218_p13, %p1212_p10 }
  0x20   :  { %1222 = shalt.err (!%p1219_p0)
}
  0x21   :  { %s1254_s1 = smov 128   ;;  %s1255_s8 = smov 8  }
  0x22   :  { %48 = dma.hbm_to_vmem [thread:$0]  %s1310_s3, 2048, %s43_s28, [#allocation6], %s1254_s1, %s1254_s1, %s1255_s8  }
  0x23   :  { %1243 = dma.done.wait [#allocation3], 1024  }
  0x24   :  { %1244 = vsyncadd [#allocation3], 4294966272 }
  0x25   :  { %1245 = dma.done.wait [#allocation6], 10240  }
  0x26   :  { %1246 = vsyncadd [#allocation6], 4294957056  ;;  %v1095_v0 = vld [vmem:[#allocation5 + $0x78] sm:$0xff]   ;;  %v1099_v4 = vld [vmem:[#allocation5 + $0x70] sm:$0xff]   ;;  %vm1257_vm0 = vmmov 0  }
  0x27   :  { %v1096_v1 = vld [vmem:[#allocation5 + $0xf8] sm:$0xff]   ;;  %945 = vmatprep.subr.bf16.mxu0 %v1095_v0  ;;  %v1100_v5 = vld [vmem:[#allocation5 + $0xf0] sm:$0xff]   ;;  %v1103_v8 = vld [vmem:[#allocation5 + $0x68] sm:$0xff]  }
  0x28   :  { %v1097_v2 = vld [vmem:[#allocation5 + $0x38] sm:$0xff]   ;;  %967 = vmatprep.subr.bf16.mxu1 %v1096_v1  ;;  %v1101_v6 = vld [vmem:[#allocation5 + $0x30] sm:$0xff]   ;;  %v1104_v9 = vld [vmem:[#allocation5 + $0xe8] sm:$0xff]  }
  0x29   :  { %v1098_v3 = vld [vmem:[#allocation5 + $0xb8] sm:$0xff]   ;;  %946 = vmatpush3.bf16.msra.mxu0 %v1097_v2  ;;  %v1102_v7 = vld [vmem:[#allocation5 + $0xb0] sm:$0xff]   ;;  %v1105_v10 = vld [vmem:[#allocation5 + $0x28] sm:$0xff]  }
  0x2a   :  { %968 = vmatpush3.bf16.msra.mxu1 %v1098_v3  ;;  %947 = vmatprep.subr.bf16.mxu0 %v1099_v4  ;;  %v1106_v11 = vld [vmem:[#allocation5 + $0xa8] sm:$0xff]   ;;  %v1107_v12 = vld [vmem:[#allocation5 + $0x60] sm:$0xff]   ;;  %v1111_v16 = vld [vmem:[#allocation5 + $0x58] sm:$0xff]  }
  0x2b   :  { %969 = vmatprep.subr.bf16.mxu1 %v1100_v5  ;;  %v1108_v13 = vld [vmem:[#allocation5 + $0xe0] sm:$0xff]   ;;  %v1112_v17 = vld [vmem:[#allocation5 + $0xd8] sm:$0xff]   ;;  %v1115_v20 = vld [vmem:[#allocation5 + $0x50] sm:$0xff]  }
  0x2c   :  { %v1109_v14 = vld [vmem:[#allocation5 + $0x20] sm:$0xff]   ;;  %v1113_v18 = vld [vmem:[#allocation5 + $0x18] sm:$0xff]   ;;  %v1116_v21 = vld [vmem:[#allocation5 + $0xd0] sm:$0xff]  }
  0x2d   :  { %948 = vmatpush3.bf16.msra.mxu0 %v1101_v6  ;;  %v1110_v15 = vld [vmem:[#allocation5 + $0xa0] sm:$0xff]   ;;  %v1114_v19 = vld [vmem:[#allocation5 + $0x98] sm:$0xff]   ;;  %v1117_v22 = vld [vmem:[#allocation5 + $0x10] sm:$0xff]  }
  0x2e   :  { %970 = vmatpush3.bf16.msra.mxu1 %v1102_v7  ;;  %949 = vmatprep.subr.bf16.mxu0 %v1103_v8  ;;  %v1118_v23 = vld [vmem:[#allocation5 + $0x90] sm:$0xff]   ;;  %v1119_v24 = vld [vmem:[#allocation5 + $0x48] sm:$0xff]   ;;  %v1123_v28 = vld [vmem:[#allocation5 + $0x40] sm:$0xff]  }
  0x2f   :  { %971 = vmatprep.subr.bf16.mxu1 %v1104_v9  ;;  %v1120_v25 = vld [vmem:[#allocation5 + $0xc8] sm:$0xff]   ;;  %v1124_v29 = vld [vmem:[#allocation5 + $0xc0] sm:$0xff]   ;;  %v64_v33 = vld [vmem:[#allocation2 + $0x18] sm:$0xff] }
  0x30   :  { %v1121_v26 = vld [vmem:[#allocation5 + $0x8] sm:$0xff]   ;;  %v1125_v30 = vld [vmem:[#allocation5] sm:$0xff]   ;;  %v72_v36 = vpack.c.bf16 %v64_v33, %v64_v33  ;;  %v63_v38 = vld [vmem:[#allocation2 + $0x10] sm:$0xff] }
  0x31   :  { %950 = vmatpush3.bf16.msra.mxu0 %v1105_v10  ;;  %v1122_v27 = vld [vmem:[#allocation5 + $0x88] sm:$0xff]   ;;  %v1126_v31 = vld [vmem:[#allocation5 + $0x80] sm:$0xff]   ;;  %v71_v39 = vpack.c.bf16 %v63_v38, %v63_v38  ;;  %v1127_v40 = vld [vmem:[#allocation5 + $0x178] sm:$0xff]  }
  0x32   :  { %972 = vmatpush3.bf16.msra.mxu1 %v1106_v11  ;;  %951 = vmatprep.subr.bf16.mxu0 %v1107_v12  ;;  %v62_v32 = vld [vmem:[#allocation2 + $0x8] sm:$0xff]  ;;  %v61_v34 = vld [vmem:[#allocation2] sm:$0xff]  ;;  %v1128_v41 = vld [vmem:[#allocation5 + $0x1f8] sm:$0xff]  }
  0x33   :  { %973 = vmatprep.subr.bf16.mxu1 %v1108_v13  ;;  %v70_v35 = vpack.c.bf16 %v62_v32, %v62_v32  ;;  %v69_v37 = vpack.c.bf16 %v61_v34, %v61_v34  ;;  %668 = vmatprep.mubr.bf16.mxu1 %v72_v36  ;;  %v1129_v42 = vld [vmem:[#allocation5 + $0x138] sm:$0xff]   ;;  %v1131_v44 = vld [vmem:[#allocation5 + $0x170] sm:$0xff]   ;;  %v1135_v48 = vld [vmem:[#allocation5 + $0x168] sm:$0xff]  }
  0x34   :  { %v1130_v43 = vld [vmem:[#allocation5 + $0x1b8] sm:$0xff]   ;;  %v1132_v45 = vld [vmem:[#allocation5 + $0x1f0] sm:$0xff]   ;;  %v1136_v49 = vld [vmem:[#allocation5 + $0x1e8] sm:$0xff]  }
  0x35   :  { %952 = vmatpush3.bf16.msra.mxu0 %v1109_v14  ;;  %628 = vmatprep.mubr.bf16.mxu0 %v70_v35  ;;  %v1133_v46 = vld [vmem:[#allocation5 + $0x130] sm:$0xff]   ;;  %v1137_v50 = vld [vmem:[#allocation5 + $0x128] sm:$0xff]   ;;  %v1139_v52 = vld [vmem:[#allocation5 + $0x160] sm:$0xff]  }
  0x36   :  { %974 = vmatpush3.bf16.msra.mxu1 %v1110_v15  ;;  %953 = vmatprep.subr.bf16.mxu0 %v1111_v16  ;;  %v1134_v47 = vld [vmem:[#allocation5 + $0x1b0] sm:$0xff]   ;;  %v1138_v51 = vld [vmem:[#allocation5 + $0x1a8] sm:$0xff]   ;;  %v1140_v53 = vld [vmem:[#allocation5 + $0x1e0] sm:$0xff]  }
  0x37   :  { %975 = vmatprep.subr.bf16.mxu1 %v1112_v17  ;;  %v1141_v54 = vld [vmem:[#allocation5 + $0x120] sm:$0xff]   ;;  %v1143_v56 = vld [vmem:[#allocation5 + $0x158] sm:$0xff]   ;;  %v1147_v60 = vld [vmem:[#allocation5 + $0x150] sm:$0xff]   ;;  %v1256_v17 = vmov 0.0  }
  0x38   :  { %v1142_v55 = vld [vmem:[#allocation5 + $0x1a0] sm:$0xff]   ;;  %v1144_v57 = vld [vmem:[#allocation5 + $0x1d8] sm:$0xff]   ;;  %v1148_v61 = vld [vmem:[#allocation5 + $0x1d0] sm:$0xff]  }
  0x39   :  { %954 = vmatpush3.bf16.msra.mxu0 %v1113_v18  ;;  %v1145_v58 = vld [vmem:[#allocation5 + $0x118] sm:$0xff]   ;;  %v1149_v62 = vld [vmem:[#allocation5 + $0x110] sm:$0xff]   ;;  %v1151_v0 = vld [vmem:[#allocation5 + $0x148] sm:$0xff]  }
  0x3a   :  { %976 = vmatpush3.bf16.msra.mxu1 %v1114_v19  ;;  %955 = vmatprep.subr.bf16.mxu0 %v1115_v20  ;;  %v1146_v59 = vld [vmem:[#allocation5 + $0x198] sm:$0xff]   ;;  %v1150_v63 = vld [vmem:[#allocation5 + $0x190] sm:$0xff]   ;;  %v1152_v1 = vld [vmem:[#allocation5 + $0x1c8] sm:$0xff]  }
  0x3b   :  { %977 = vmatprep.subr.bf16.mxu1 %v1116_v21  ;;  %v1153_v2 = vld [vmem:[#allocation5 + $0x108] sm:$0xff]   ;;  %v1155_v4 = vld [vmem:[#allocation5 + $0x140] sm:$0xff]   ;;  %v68_v9 = vld [vmem:[#allocation2 + $0x38] sm:$0xff] }
  0x3c   :  { %v1154_v3 = vld [vmem:[#allocation5 + $0x188] sm:$0xff]   ;;  %v1156_v5 = vld [vmem:[#allocation5 + $0x1c0] sm:$0xff]   ;;  %v76_v11 = vpack.c.bf16 %v68_v9, %v68_v9  ;;  %v67_v13 = vld [vmem:[#allocation2 + $0x30] sm:$0xff] }
  0x3d   :  { %956 = vmatpush3.bf16.msra.mxu0 %v1117_v22  ;;  %v1157_v6 = vld [vmem:[#allocation5 + $0x100] sm:$0xff]   ;;  %v66_v8 = vld [vmem:[#allocation2 + $0x28] sm:$0xff]  ;;  %v75_v15 = vpack.c.bf16 %v67_v13, %v67_v13  ;;  %v772_v16 = vld [vmem:[#allocation7 + $0x78] sm:$0xff] }
  0x3e   :  { %978 = vmatpush3.bf16.msra.mxu1 %v1118_v23  ;;  %957 = vmatprep.subr.bf16.mxu0 %v1119_v24  ;;  %v1158_v7 = vld [vmem:[#allocation5 + $0x180] sm:$0xff]   ;;  %v74_v10 = vpack.c.bf16 %v66_v8, %v66_v8  ;;  %v771_v18 = vld [vmem:[#allocation7 + $0x70] sm:$0xff]  ;;  %v770_v19 = vld [vmem:[#allocation7 + $0x68] sm:$0xff] }
  0x3f   :  { %979 = vmatprep.subr.bf16.mxu1 %v1120_v25  ;;  %v65_v12 = vld [vmem:[#allocation2 + $0x20] sm:$0xff]  ;;  %v768_v21 = vld [vmem:[#allocation7 + $0x58] sm:$0xff]  ;;  %v767_v22 = vld [vmem:[#allocation7 + $0x50] sm:$0xff] }
  0x40   :  { %v73_v14 = vpack.c.bf16 %v65_v12, %v65_v12  ;;  %v769_v20 = vld [vmem:[#allocation7 + $0x60] sm:$0xff]  ;;  %v766_v23 = vld [vmem:[#allocation7 + $0x48] sm:$0xff]  ;;  %v764_v25 = vld [vmem:[#allocation7 + $0x38] sm:$0xff] }
  0x41   :  { %958 = vmatpush3.bf16.msra.mxu0 %v1121_v26  ;;  %v765_v24 = vld [vmem:[#allocation7 + $0x40] sm:$0xff]  ;;  %v763_v26 = vld [vmem:[#allocation7 + $0x30] sm:$0xff] }
  0x42   :  { %980 = vmatpush3.bf16.msra.mxu1 %v1122_v27  ;;  %959 = vmatprep.subr.bf16.mxu0 %v1123_v28  ;;  %v762_v27 = vld [vmem:[#allocation7 + $0x28] sm:$0xff]  ;;  %v761_v28 = vld [vmem:[#allocation7 + $0x20] sm:$0xff] }
  0x43   :  { %981 = vmatprep.subr.bf16.mxu1 %v1124_v29  ;;  %v760_v29 = vld [vmem:[#allocation7 + $0x18] sm:$0xff]  ;;  %v757_v32 = vld [vmem:[#allocation7] sm:$0xff] }
  0x45   :  { %960 = vmatpush3.bf16.msra.mxu0 %v1125_v30  ;;  %v759_v30 = vld [vmem:[#allocation7 + $0x10] sm:$0xff] }
  0x46   :  { %982 = vmatpush3.bf16.msra.mxu1 %v1126_v31  ;;  %989 = vmatprep.subr.bf16.mxu0 %v1127_v40  ;;  %v758_v31 = vld [vmem:[#allocation7 + $0x8] sm:$0xff] }
  0x47   :  { %1011 = vmatprep.subr.bf16.mxu1 %v1128_v41 }
  0x48   :  { %629 = vmatmul.mubr.bf16.vlgmr.msra.gmra.mxu0 %v69_v37 }
  0x49   :  { %669 = vmatmul.mubr.bf16.vlgmr.msra.gmra.mxu1 %v71_v39  ;;  %990 = vmatpush3.bf16.msra.mxu0 %v1129_v42  ;;  %v879_v42 = vld [vmem:[%s1309_s2] ss:$0 sm:$0xff]  ;;  %s1258_s2 = smov [#allocation8]  }
  0x4a   :  { %1012 = vmatpush3.bf16.msra.mxu1 %v1130_v43  ;;  %991 = vmatprep.subr.bf16.mxu0 %v1131_v44  ;;  %s869_s13 = sshll.u32 %s1258_s2, 4  ;;  %s870_s13 = int_to_ptr.vmem [resolvable:$true] %s869_s13 }
  0x4b   :  { %1013 = vmatprep.subr.bf16.mxu1 %v1132_v45  ;;  %708 = vmatprep.mubr.bf16.mxu0 %v74_v10  ;;  %p1228_p2 = scmp.lt.s32.totalorder %s870_s13, %s870_s13 }
  0x4c   :  { %748 = vmatprep.mubr.bf16.mxu1 %v76_v11 }
  0x4d   :  { %992 = vmatpush3.bf16.msra.mxu0 %v1133_v46 }
  0x4e   :  { %1014 = vmatpush3.bf16.msra.mxu1 %v1134_v47  ;;  %993 = vmatprep.subr.bf16.mxu0 %v1135_v48 }
  0x4f   :  { %1015 = vmatprep.subr.bf16.mxu1 %v1136_v49 }
  0x51   :  { %994 = vmatpush3.bf16.msra.mxu0 %v1137_v50 }
  0x52   :  { %1016 = vmatpush3.bf16.msra.mxu1 %v1138_v51  ;;  %995 = vmatprep.subr.bf16.mxu0 %v1139_v52 }
  0x53   :  { %1017 = vmatprep.subr.bf16.mxu1 %v1140_v53 }
  0x55   :  { %996 = vmatpush3.bf16.msra.mxu0 %v1141_v54 }
  0x56   :  { %1018 = vmatpush3.bf16.msra.mxu1 %v1142_v55  ;;  %997 = vmatprep.subr.bf16.mxu0 %v1143_v56 }
  0x57   :  { %1019 = vmatprep.subr.bf16.mxu1 %v1144_v57 }
  0x59   :  { %998 = vmatpush3.bf16.msra.mxu0 %v1145_v58 }
  0x5a   :  { %1020 = vmatpush3.bf16.msra.mxu1 %v1146_v59  ;;  %999 = vmatprep.subr.bf16.mxu0 %v1147_v60  ;;  %v944_v59 = vld [vmem:[%s1311_s4] ss:$0 sm:$0xff]  ;;  %s1223_s4 = scalar_lea.vmem %s870_s13, 128 }
  0x5b   :  { %1021 = vmatprep.subr.bf16.mxu1 %v1148_v61  ;;  %p1224_p1 = scmp.ne.s32.totalorder %s870_s13, %s1223_s4  ;;  %p1229_p3 = scmp.lt.s32.totalorder %s1223_s4, %s1223_s4 }
  0x5d   :  { %1000 = vmatpush3.bf16.msra.mxu0 %v1149_v62  ;;  %p1230_p4 = por %p1229_p3, %p1228_p2 }
  0x5e   :  { %1022 = vmatpush3.bf16.msra.mxu1 %v1150_v63  ;;  %1001 = vmatprep.subr.bf16.mxu0 %v1151_v0 }
  0x5f   :  { %1023 = vmatprep.subr.bf16.mxu1 %v1152_v1  ;;  %p1231_p5 = pnand %p1230_p4, %p1224_p1 }
  0x61   :  { %1002 = vmatpush3.bf16.msra.mxu0 %v1153_v2 }
  0x62   :  { %1024 = vmatpush3.bf16.msra.mxu1 %v1154_v3  ;;  %1003 = vmatprep.subr.bf16.mxu0 %v1155_v4 }
  0x63   :  { %1025 = vmatprep.subr.bf16.mxu1 %v1156_v5 }
  0x65   :  { %1004 = vmatpush3.bf16.msra.mxu0 %v1157_v6 }
  0x66   :  { %1026 = vmatpush3.bf16.msra.mxu1 %v1158_v7  ;;  %1050 = vmatprep.subr.mxu0 %v1256_v17 }
  0x68   :  { %709 = vmatmul.mubr.bf16.vlgmr.msra.gmra.mxu0 %v73_v14 }
  0x69   :  { %749 = vmatmul.mubr.bf16.vlgmr.msra.gmra.mxu1 %v75_v15  ;;  %1051 = vmatpush3.msra.mxu0 %v772_v16 }
  0x6a   :  { %1052 = vmatprep.subr.mxu0 %v1256_v17  ;;  %1082 = vmatprep.mubr.msk.f32.mxu0 %vm1257_vm0, %v1256_v17 }
  0x6b   :  { %1053 = vmatpush3.msra.mxu0 %v771_v18 }
  0x6c   :  { %1054 = vmatprep.subr.mxu0 %v1256_v17 }
  0x6d   :  { %1055 = vmatpush3.msra.mxu0 %v770_v19 }
  0x6e   :  { %1056 = vmatprep.subr.mxu0 %v1256_v17 }
  0x6f   :  { %1057 = vmatpush3.msra.mxu0 %v769_v20 }
  0x70   :  { %1058 = vmatprep.subr.mxu0 %v1256_v17 }
  0x71   :  { %1059 = vmatpush3.msra.mxu0 %v768_v21 }
  0x72   :  { %1060 = vmatprep.subr.mxu0 %v1256_v17 }
  0x73   :  { %1061 = vmatpush3.msra.mxu0 %v767_v22 }
  0x74   :  { %1062 = vmatprep.subr.mxu0 %v1256_v17 }
  0x75   :  { %1063 = vmatpush3.msra.mxu0 %v766_v23 }
  0x76   :  { %1064 = vmatprep.subr.mxu0 %v1256_v17 }
  0x77   :  { %1065 = vmatpush3.msra.mxu0 %v765_v24 }
  0x78   :  { %1066 = vmatprep.subr.mxu0 %v1256_v17 }
  0x79   :  { %1067 = vmatpush3.msra.mxu0 %v764_v25 }
  0x7a   :  { %1068 = vmatprep.subr.mxu0 %v1256_v17 }
  0x7b   :  { %1069 = vmatpush3.msra.mxu0 %v763_v26 }
  0x7c   :  { %1070 = vmatprep.subr.mxu0 %v1256_v17 }
  0x7d   :  { %1071 = vmatpush3.msra.mxu0 %v762_v27 }
  0x7e   :  { %1072 = vmatprep.subr.mxu0 %v1256_v17 }
  0x7f   :  { %1073 = vmatpush3.msra.mxu0 %v761_v28 }
  0x80   :  { %1074 = vmatprep.subr.mxu0 %v1256_v17 }
  0x81   :  { %1075 = vmatpush3.msra.mxu0 %v760_v29 }
  0x82   :  { %1076 = vmatprep.subr.mxu0 %v1256_v17 }
  0x83   :  { %1077 = vmatpush3.msra.mxu0 %v759_v30 }
  0x84   :  { %1078 = vmatprep.subr.mxu0 %v1256_v17 }
  0x85   :  { %1079 = vmatpush3.msra.mxu0 %v758_v31 }
  0x86   :  { %1080 = vmatprep.subr.mxu0 %v1256_v17 }
  0x87   :  { %1081 = vmatpush3.msra.mxu0 %v757_v32 }
 0x108   :  { %v961_v33 = vpop.f32.mrf.mxu0 }
 0x109   :  { %v983_v34 = vpop.f32.mrf.mxu1 }
 0x10a   :  { %v962_v35 = vpop.f32.mrf.mxu0 }
 0x10b   :  { %v984_v36 = vpop.f32.mrf.mxu1  ;;  %v963_v41 = vadd.f32 %v962_v35, %v961_v33 }
 0x10c   :  { %v964_v37 = vpop.f32.mrf.mxu0  ;;  %v985_v44 = vadd.f32 %v984_v36, %v983_v34 }
 0x10d   :  { %v986_v38 = vpop.f32.mrf.mxu1  ;;  %v631_v43 = vadd.f32 %v963_v41, %v879_v42 }
 0x10e   :  { %v965_v39 = vpop.f32.mrf.mxu0 }
 0x10f   :  { %v987_v40 = vpop.f32.mrf.mxu1  ;;  %v671_v48 = vadd.f32 %v985_v44, %v631_v43 }
 0x128   :  { %v1005_v45 = vpop.f32.mrf.mxu0 }
 0x129   :  { %v1027_v46 = vpop.f32.mrf.mxu1 }
 0x12a   :  { %v1006_v47 = vpop.f32.mrf.mxu0 }
 0x12b   :  { %v1007_v49 = vadd.f32 %v1006_v47, %v1005_v45  ;;  %v1028_v50 = vpop.f32.mrf.mxu1 }
 0x12c   :  { %v1008_v51 = vpop.f32.mrf.mxu0  ;;  %v1029_v53 = vadd.f32 %v1028_v50, %v1027_v46 }
 0x12d   :  { %v711_v52 = vadd.f32 %v1007_v49, %v671_v48  ;;  %v1030_v54 = vpop.f32.mrf.mxu1 }
 0x12e   :  { %v1009_v55 = vpop.f32.mrf.mxu0 }
 0x12f   :  { %v751_v56 = vadd.f32 %v1029_v53, %v711_v52  ;;  %v1031_v57 = vpop.f32.mrf.mxu1 }
 0x131   :  { %v756_v58 = vmax.f32 %v751_v56, 0.0 }
 0x133   :  { %1083 = vmatmul.mubr.f32.vlgmr.msra.gmra.mxu0 %v756_v58 }
 0x1f3   :  { %v846_v60 = vpop.f32.mrf.mxu0 }
 0x1f4   :  { %v847_v61 = vadd.f32 %v944_v59, %v846_v60 }
 0x1f5   :  { %v1084_v62 = vpop.f32.mrf.mxu0 }
 0x1f6   :  { %850 = vmax.xlane.f32.xlu0 %v847_v61 }
 0x27f   :  { %v851_v63 = vpop.xlane.xlu0 %850 }
 0x280   :  { %v852_v0 = vsub.f32 %v847_v61, %v851_v63 }
 0x282   :  { %v853_v1 = vmul.f32 1.442695, %v852_v0 }
 0x284   :  { %1159 = vpow2.f32 %v853_v1 }
 0x291   :  { %v1160_v2 = vpop.eup %1159 }
 0x292   :  { %855 = vadd.xlane.f32.xlu0 %v1160_v2 }
 0x31b   :  { %v856_v3 = vpop.xlane.xlu0 %855 }
 0x31c   :  { %1161 = vrcp.f32 %v856_v3 }
 0x329   :  { %v1162_v4 = vpop.eup %1161 }
 0x32a   :  { %v858_v5 = vmul.f32 %v1162_v4, %v856_v3 }
 0x32c   :  { %v859_v6 = vsub.f32 2.0, %v858_v5 }
 0x32e   :  { %v860_v7 = vmul.f32 %v1162_v4, %v859_v6 }
 0x330   :  { %v861_v8 = vmul.f32 %v1160_v2, %v860_v7 }
 0x332   :  { %862 = vst [vmem:[#allocation8] sm:$0xff] %v861_v8 }
 0x333   :  { %1234 = shalt.err (!%p1231_p5)
}
 0x334   :  { %872 = dma.vmem_to_hbm [thread:$0]  %s870_s13, 128, %s1312_s5, [#allocation4]  }
 0x335   :  { %1247 = dma.done.wait [#allocation4], 128  }
 0x336   :  { %1248 = vsyncadd [#allocation4], 4294967168 }
 0x337   :  { %876 = vsyncpa [#allocation3], 1 }
 0x338   :  { %877 = vsyncpa [#allocation6], 1 }
 0x339   :  { %878 = vsyncpa [#allocation4], 1 }

</bundles_post_ra>
